<compile_context>
chip_gen: v6e
topology: v6e:2x2x1
jax: 0.10.0
libtpu: 0.0.40
codegen_flags: <defaults>
</compile_context>

<pallas_src>
import jax
import jax.numpy as jnp
from jax.experimental import pallas as pl
from jax.experimental.pallas import tpu as pltpu


def _round_up(x, m):
    return ((x + m - 1) // m) * m


def _linear_kernel(x_ref, w_ref, b_ref, o_ref):
    # x_ref: (tm, Kp) bf16   w_ref: (Kp, Np) bf16   b_ref: (1, Np) f32
    # o_ref: (tm, Np) f32 ; Np is lane-dense (multiple of 128 at toy config).
    acc = jnp.dot(x_ref[...], w_ref[...], preferred_element_type=jnp.float32)
    o_ref[...] = (acc + b_ref[...]).astype(o_ref.dtype)


def _packed_linear(x2d, w_t, bias, *, pack, tm_max=512,
                   compute_dtype=jnp.bfloat16):
    """y = x2d @ w_t + bias, with `pack` consecutive rows fused into one
    lane-dense output row via a block-diagonal weight."""
    M, K = x2d.shape
    K2, N = w_t.shape
    assert K == K2

    # ---- row packing / padding (sublane-dense, unmasked stores) ----
    m4 = -(-M // pack)                                   # cdiv(M, pack)
    # >=2 grid steps when possible (v7x megacore); tm multiple of 16 (bf16).
    tm = max(16, min(tm_max, _round_up(-(-m4 // 2), 16)))
    m4p = _round_up(m4, tm)
    mp = m4p * pack

    xp = jnp.pad(x2d, ((0, mp - M), (0, 0))).astype(compute_dtype)
    xp = xp.reshape(m4p, pack * K)                       # (m4p, pack*K)

    # ---- block-diagonal weight + tiled bias (pack*N-wide output) ----
    w_bd = jnp.kron(jnp.eye(pack, dtype=w_t.dtype), w_t).astype(compute_dtype)
    b_bd = jnp.tile(bias.reshape(1, N).astype(jnp.float32), (1, pack))

    grid = (m4p // tm,)
    y = pl.pallas_call(
        _linear_kernel,
        out_shape=jax.ShapeDtypeStruct((m4p, pack * N), jnp.float32),
        grid_spec=pltpu.PrefetchScalarGridSpec(
            num_scalar_prefetch=0,
            grid=grid,
            in_specs=[
                pl.BlockSpec((tm, pack * K), lambda i: (i, 0)),
                pl.BlockSpec((pack * K, pack * N), lambda i: (0, 0)),
                pl.BlockSpec((1, pack * N), lambda i: (0, 0)),
            ],
            out_specs=pl.BlockSpec((tm, pack * N), lambda i: (i, 0)),
        ),
        compiler_params=pltpu.CompilerParams(
            dimension_semantics=("parallel",),
            # let XLA fuse the unfold reshape/transpose/pad into operand 0's
            # input path instead of a separate HBM pass.
            allow_input_fusion=[True, False, False],
        ),
    )(xp, w_bd, b_bd)

    # unpack: (m4p, pack*N) -> (mp, N) -> (M, N)
    return y.reshape(mp, N)[:M]


def patch_merging_forward(x, weight, bias, downscaling_factor,
                          *, compute_dtype=jnp.bfloat16):
    """
    x:      (B, C, H, W)        NCHW, like the PyTorch module
    weight: (out_dims, C*d*d)   nn.Linear layout
    bias:   (out_dims,)
    returns (B, H_, W_, out_dims) float32
    """
    d = downscaling_factor
    B, C, H, W = x.shape
    H_, W_ = H // d, W // d
    K = C * d * d
    N = weight.shape[0]

    # Cast first so the unfold transpose moves half the bytes if not fused.
    x = x.astype(compute_dtype)

    # nn.Unfold(kernel=d, stride=d): feature order is (c, kh, kw).
    xp = x.reshape(B, C, H_, d, W_, d)
    xp = jnp.transpose(xp, (0, 2, 4, 1, 3, 5)).reshape(B * H_ * W_, K)

    # Pack rows so the output tile is lane-dense (out_dims=32 -> pack=4 -> 128).
    pack = 1 if N >= 128 else max(1, 128 // N)

    w_t = jnp.transpose(weight)            # tiny; folded into block-diag below
    y = _packed_linear(xp, w_t, bias, pack=pack, compute_dtype=compute_dtype)
    return y.reshape(B, H_, W_, N)


if __name__ == "__main__":
    # Module config: in_dims=4, out_dims=32, downscaling_factor=2; x: (2,4,16,16).
    in_dims, out_dims, dfac = 4, 32, 2
    B, H, W = 2, 16, 16

    key = jax.random.PRNGKey(0)
    kx, kw, kb = jax.random.split(key, 3)

    x = jax.random.normal(kx, (B, in_dims, H, W), dtype=jnp.float32)

    fan_in = in_dims * dfac * dfac
    bound = 1.0 / (fan_in ** 0.5)
    weight = jax.random.uniform(kw, (out_dims, fan_in), minval=-bound,
                                maxval=bound, dtype=jnp.float32)
    bias = jax.random.uniform(kb, (out_dims,), minval=-bound,
                              maxval=bound, dtype=jnp.float32)

    fwd = jax.jit(patch_merging_forward, static_argnums=(3,))
    out = jax.block_until_ready(fwd(x, weight, bias, dfac))

    # Reference: same unfold + linear with inputs rounded to bf16 (matching the
    # kernel's compute dtype), accumulated in f32 -> tight tolerance.
    H_, W_ = H // dfac, W // dfac
    xr = x.astype(jnp.bfloat16).astype(jnp.float32)
    wr = weight.astype(jnp.bfloat16).astype(jnp.float32)
    xp = xr.reshape(B, in_dims, H_, dfac, W_, dfac)
    xp = jnp.transpose(xp, (0, 2, 4, 1, 3, 5)).reshape(B, H_, W_, -1)
    ref = xp @ wr.T + bias

    assert out.shape == (B, H_, W_, out_dims)
    assert out.dtype == jnp.float32
    assert jnp.allclose(out, ref, atol=1e-4, rtol=1e-4), float(
        jnp.max(jnp.abs(out - ref)))

    print("KERNEL_OK")
</pallas_src>

<mosaic_0001>
module attributes {stable_mosaic.version = 11 : i64} {
  func.func @_linear_kernel(%arg0: i32, %arg1: memref<16x64xbf16, #tpu.memory_space<vmem>>, %arg2: memref<64x128xbf16, #tpu.memory_space<vmem>>, %arg3: memref<1x128xf32, #tpu.memory_space<vmem>>, %arg4: memref<16x128xf32, #tpu.memory_space<vmem>>) attributes {dimension_semantics = [#tpu.dimension_semantics<parallel>], iteration_bounds = array<i64: 2>, scalar_prefetch = 0 : i64, scratch_operands = 0 : i64, tpu.core_type = #tpu.core_type<tc>, window_params = [{transform_indices = @transform_0, window_bounds = array<i64: 16, 64>}, {pipeline_mode = #tpu.pipeline_mode<synchronous>, transform_indices = @transform_1, window_bounds = array<i64: 64, 128>}, {pipeline_mode = #tpu.pipeline_mode<synchronous>, transform_indices = @transform_2, window_bounds = array<i64: 1, 128>}, {transform_indices = @transform_3, window_bounds = array<i64: 16, 128>}]} {
    %c0 = arith.constant 0 : index
    %c0_0 = arith.constant 0 : index
    %0 = vector.load %arg1[%c0, %c0_0] : memref<16x64xbf16, #tpu.memory_space<vmem>>, vector<16x64xbf16>
    %c0_1 = arith.constant 0 : index
    %c0_2 = arith.constant 0 : index
    %1 = vector.load %arg2[%c0_1, %c0_2] : memref<64x128xbf16, #tpu.memory_space<vmem>>, vector<64x128xbf16>
    %cst = arith.constant dense<0.000000e+00> : vector<16x128xf32>
    %2 = tpu.matmul %0, %1, %cst {dimension_numbers = #tpu.dot_dimension_numbers<[1], [0], [0], [1], [0, 0, 1, 1], [], []>} : vector<16x64xbf16>, vector<64x128xbf16>, vector<16x128xf32> -> vector<16x128xf32>
    %c0_3 = arith.constant 0 : index
    %c0_4 = arith.constant 0 : index
    %3 = vector.load %arg3[%c0_3, %c0_4] : memref<1x128xf32, #tpu.memory_space<vmem>>, vector<1x128xf32>
    %4 = vector.broadcast %3 : vector<1x128xf32> to vector<16x128xf32>
    %5 = arith.addf %2, %4 : vector<16x128xf32>
    %c0_5 = arith.constant 0 : index
    %c0_6 = arith.constant 0 : index
    %6 = vector.load %arg4[%c0_5, %c0_6] : memref<16x128xf32, #tpu.memory_space<vmem>>, vector<16x128xf32>
    tpu.vector_store %arg4[%c0_5, %c0_6], %5 {strides = array<i32>} : memref<16x128xf32, #tpu.memory_space<vmem>>, vector<16x128xf32>,
    return
  }
  func.func @transform_0(%arg0: i32) -> (i32, i32) {
    %c0_i32 = arith.constant 0 : i32
    %c0_i32_0 = arith.constant 0 : i32
    return %arg0, %c0_i32 : i32, i32
  }
  func.func @transform_1(%arg0: i32) -> (i32, i32) {
    %c0_i32 = arith.constant 0 : i32
    %c0_i32_0 = arith.constant 0 : i32
    %c0_i32_1 = arith.constant 0 : i32
    return %c0_i32, %c0_i32_0 : i32, i32
  }
  func.func @transform_2(%arg0: i32) -> (i32, i32) {
    %c0_i32 = arith.constant 0 : i32
    %c0_i32_0 = arith.constant 0 : i32
    %c0_i32_1 = arith.constant 0 : i32
    return %c0_i32, %c0_i32_0 : i32, i32
  }
  func.func @transform_3(%arg0: i32) -> (i32, i32) {
    %c0_i32 = arith.constant 0 : i32
    %c0_i32_0 = arith.constant 0 : i32
    return %arg0, %c0_i32 : i32, i32
  }
}

</mosaic_0001>

<bundles_post_ra>
// kernel: patch_merging_forward.1
= control target key start
LH: loop header
LB: loop body
LE: loop exit
PB: predicated region body
PF: predicated region fallthrough
CT: control target
= control target key end

     0   :  { %s404_s12 = smov 0   ;;  %s436_s0 = inlined_call_operand.vmem [shape: bf16[32,64], index: 0, kind: input, shape index: {}]   ;;  %s437_s1 = inlined_call_operand.vmem [shape: bf16[64,128], index: 1, kind: input, shape index: {}]   ;;  %s438_s2 = inlined_call_operand.vmem [shape: f32[1,128], index: 2, kind: input, shape index: {}]   ;;  %s439_s3 = inlined_call_operand.vmem [shape: f32[32,128], index: 3, kind: output, shape index: {}]  }
   0x1 LB: > { %s324_s13 = sadd.s32 4294967295, %s380_s12   ;;  %p328_p0 = scmp.ge.s32.totalorder %s380_s12, 1  ;;  %s380_s12 = sphi %s404_s12, %s13_s12  }
   0x2   : > { %p138_p1 = scmp.lt.s32.totalorder %s380_s12, 3 }
   0x4   : > { %p139_p2 = pnand %p328_p0, %p138_p1 }
   0x5   : > { %s329_s18 = sshll.u32 (!%p139_p2), %s324_s13, 1 }
   0x6   : > { %142 = sbr.rel (%p139_p2) target bundleno = 228 (0xe4), region = 32  ;;  %p163_p3 = scmp.lt.s32.totalorder (!%p139_p2), %s329_s18, 3 }
   0xb   : > { %v369_v0 = vld [vmem:[%s437_s1 + $0x18] sm:$0xff]   ;;  %v382_v1 = vmov 0.0   ;;  %v370_v2 = vld [vmem:[%s437_s1 + $0x10] sm:$0xff]   ;;  %vm383_vm0 = vmmov 0   ;;  %s441_s18 = smov (!%p163_p3, %s329_s18), 3  ;;  %v371_v3 = vld [vmem:[%s437_s1 + $0x8] sm:$0xff]  }
   0xc   : > { %347 = vmatprep.subr.bf16.mxu0 %v382_v1  ;;  %355 = vmatprep.mubr.msk.bf16.mxu0 %vm383_vm0, %v382_v1  ;;  %s330_s21 = sshll.u32 %s441_s18, 2  ;;  %v372_v4 = vld [vmem:[%s437_s1] sm:$0xff]   ;;  %vm221_vm1 = vcmask 523264   ;;  %s332_s27 = sshll.u32 %s441_s18, 3 }
   0xd   : > { %348 = vmatpush3.bf16.msra.mxu0 %v369_v0  ;;  %s166_s24 = scalar_lea.vmem %s436_s0, %s330_s21  ;;  %v333_v6 = vld [vmem:[%s438_s2] ss:$0 sm:$0xff]  ;;  %s172_s5 = scalar_lea.vmem %s439_s3, %s332_s27 }
   0xe   : > { %349 = vmatprep.subr.bf16.mxu0 %v382_v1  ;;  %v373_v5 = vld [vmem:[%s166_s24] sm:$0xff]  }
  0x11   : > { %350 = vmatpush3.bf16.msra.mxu0 %v370_v2 }
  0x12   : > { %351 = vmatprep.subr.bf16.mxu0 %v382_v1 }
  0x15   : > { %352 = vmatpush3.bf16.msra.mxu0 %v371_v3 }
  0x16   : > { %353 = vmatprep.subr.bf16.mxu0 %v382_v1 }
  0x19   : > { %354 = vmatpush3.bf16.msra.mxu0 %v372_v4 }
  0x1c   : > { %356 = vmatmul.mubr.msk.bf16.vlgmr.msra.gmra.mxu0 %vm221_vm1, %v373_v5 }
  0xdc   : > { %v259_v7 = vpop.f32.mrf.mxu0 }
  0xdd   : > { %v260_v8 = vadd.f32 %v333_v6, %v259_v7 }
  0xde   : > { %v357_v9 = vpop.f32.mrf.mxu0 }
  0xdf   : > { %266 = vst [vmem:[%s172_s5] sm:$0xff] %v260_v8 }
  0xe0   : > { %v262_v10 = vpop.f32.mrf.mxu0 }
  0xe1   : > { %v263_v11 = vadd.f32 %v333_v6, %v262_v10 }
  0xe2   : > { %v358_v12 = vpop.f32.mrf.mxu0 }
  0xe3   : > { %267 = vst [vmem:[%s172_s5 + $0x8] sm:$0xff] %v263_v11 }
  0xe4 PF: > { %s13_s12 = sadd.s32 1, %s380_s12  }
  0xe5   : > { %p10_p4 = scmp.ge.s32.totalorder %s13_s12, 4  }
  0xe7   :  { %12 = sbr.rel (!%p10_p4) target bundleno = 1 (0x1), region = 62 }

</bundles_post_ra>
